<compile_context>
chip_gen: v5e
topology: v5e:2x2
jax: 0.10.0
libtpu: 0.0.40
codegen_flags: <defaults>
</compile_context>

<pallas_src>
import functools
import math

import jax
import jax.numpy as jnp
from jax.experimental import pallas as pl
from jax.experimental.pallas import tpu as pltpu


# ---------------------------------------------------------------------------
# Kernel
# ---------------------------------------------------------------------------
def _layernorm(x, gamma, beta, eps=1e-5):
    mean = jnp.mean(x, axis=-1, keepdims=True)
    xc = x - mean
    var = jnp.mean(xc * xc, axis=-1, keepdims=True)
    return xc * jax.lax.rsqrt(var + eps) * gamma + beta


def _encoder_layer_kernel(
    x_ref, bias_ref,
    wqkv_ref, bqkv_ref, wo_ref, bo_ref, g1_ref, bln1_ref,
    w1_ref, bf1_ref, w2_ref, bf2_ref, g2_ref, bln2_ref,
    out_ref, qkv_scr, ao_scr, *, nhead):
    x_bf = x_ref[0]                                       # (S, D) bf16
    s_len, d_model = x_bf.shape
    head_dim = d_model // nhead

    # Fused QKV projection: bf16 operands on the MXU, f32 accumulation.
    # (1/sqrt(head_dim) is already folded into the Q columns/bias on the host.)
    qkv = jax.lax.dot_general(
        x_bf, wqkv_ref[...], (((1,), (0,)), ((), ())),
        preferred_element_type=jnp.float32) + bqkv_ref[...]          # (S, 3D) f32
    qkv_scr[...] = qkv.astype(jnp.bfloat16)

    key_bias = bias_ref[0]                                 # (1, S): 0 keep / -1e30 pad

    # Per-head scaled-dot-product attention.  Head outputs land in ao_scr at
    # static column offsets so the output projection below is a single
    # full-contraction matmul (no per-head small-K matmuls, no concat value).
    for h in range(nhead):
        lo = h * head_dim
        qh = qkv_scr[:, lo:lo + head_dim]                              # bf16
        kh = qkv_scr[:, d_model + lo:d_model + lo + head_dim]          # bf16
        vh = qkv_scr[:, 2 * d_model + lo:2 * d_model + lo + head_dim]  # bf16
        sc = jax.lax.dot_general(
            qh, kh, (((1,), (1,)), ((), ())),
            preferred_element_type=jnp.float32) + key_bias             # (S, S) f32
        m = jnp.max(sc, axis=-1, keepdims=True)
        e = jnp.exp(sc - m)
        inv = pl.reciprocal(jnp.sum(e, axis=-1, keepdims=True), approx=True)
        p = (e * inv).astype(jnp.bfloat16)
        oh = jax.lax.dot_general(
            p, vh, (((1,), (0,)), ((), ())),
            preferred_element_type=jnp.float32)                        # (S, hd) f32
        ao_scr[:, lo:lo + head_dim] = oh.astype(jnp.bfloat16)

    # Single full-K output projection.
    attn = jax.lax.dot_general(
        ao_scr[...], wo_ref[...], (((1,), (0,)), ((), ())),
        preferred_element_type=jnp.float32) + bo_ref[...]              # (S, D) f32

    # Residual + LayerNorm1 (dropout1 = identity in inference), f32 math.
    x_f32 = x_bf.astype(jnp.float32)
    y = _layernorm(x_f32 + attn, g1_ref[...], bln1_ref[...])

    # Feed-forward: relu(y @ W1 + b1) @ W2 + b2 with bf16 matmul operands.
    h1 = jax.lax.dot_general(
        y.astype(jnp.bfloat16), w1_ref[...], (((1,), (0,)), ((), ())),
        preferred_element_type=jnp.float32) + bf1_ref[...]
    h1 = jnp.maximum(h1, 0.0)
    f = jax.lax.dot_general(
        h1.astype(jnp.bfloat16), w2_ref[...], (((1,), (0,)), ((), ())),
        preferred_element_type=jnp.float32) + bf2_ref[...]

    # Residual + LayerNorm2.
    out_ref[0] = _layernorm(y + f, g2_ref[...], bln2_ref[...]).astype(out_ref.dtype)


# ---------------------------------------------------------------------------
# Wrapper
# ---------------------------------------------------------------------------
def _prep_layer_params(p, nhead):
    """Host-side: fold the Q scale into W_qkv/b_qkv, cast matmul weights to bf16."""
    d_model = p["wo"].shape[0]
    scale = 1.0 / math.sqrt(d_model // nhead)
    wqkv = p["wqkv"].at[:, :d_model].multiply(scale).astype(jnp.bfloat16)
    bqkv = p["bqkv"].at[:, :d_model].multiply(scale)
    return dict(
        wqkv=wqkv, bqkv=bqkv,
        wo=p["wo"].astype(jnp.bfloat16), bo=p["bo"],
        g1=p["g1"], bln1=p["bln1"],
        w1=p["w1"].astype(jnp.bfloat16), bf1=p["bf1"],
        w2=p["w2"].astype(jnp.bfloat16), bf2=p["bf2"],
        g2=p["g2"], bln2=p["bln2"])


def _encoder_layer(x, key_bias, p, nhead):
    b, s_len, d_model = x.shape
    dim_ff = p["w1"].shape[1]

    def _full(arr):
        nd = arr.ndim
        return pl.BlockSpec(arr.shape, lambda i, _nd=nd: (0,) * _nd)

    weights = (p["wqkv"], p["bqkv"], p["wo"], p["bo"], p["g1"], p["bln1"],
               p["w1"], p["bf1"], p["w2"], p["bf2"], p["g2"], p["bln2"])

    return pl.pallas_call(
        functools.partial(_encoder_layer_kernel, nhead=nhead),
        out_shape=jax.ShapeDtypeStruct((b, s_len, d_model), jnp.bfloat16),
        grid=(b,),
        in_specs=[pl.BlockSpec((1, s_len, d_model), lambda i: (i, 0, 0)),
                  pl.BlockSpec((1, 1, s_len), lambda i: (i, 0, 0))]
                 + [_full(w) for w in weights],
        out_specs=pl.BlockSpec((1, s_len, d_model), lambda i: (i, 0, 0)),
        scratch_shapes=[pltpu.VMEM((s_len, 3 * d_model), jnp.bfloat16),
                        pltpu.VMEM((s_len, d_model), jnp.bfloat16)],
        compiler_params=pltpu.CompilerParams(
            dimension_semantics=("parallel",),
            vmem_limit_bytes=32 * 1024 * 1024),
    )(x, key_bias, *weights)


def transformer_encoder_forward(src, src_key_padding_mask, params, nhead):
    """src: (B, S, D) float, src_key_padding_mask: (B, S) bool (True = pad)."""
    b, s_len, _ = src.shape
    key_bias = jnp.where(src_key_padding_mask,
                         jnp.float32(-1e30), jnp.float32(0.0)).reshape(b, 1, s_len)
    x = src.astype(jnp.bfloat16)
    for p in params:
        x = _encoder_layer(x, key_bias, _prep_layer_params(p, nhead), nhead)
    return x


# ---------------------------------------------------------------------------
# Parameters + pure-JAX reference
# ---------------------------------------------------------------------------
def init_params(key, num_layers, d_model, dim_feedforward):
    params = []
    for _ in range(num_layers):
        key, *ks = jax.random.split(key, 11)
        params.append(dict(
            wqkv=jax.random.normal(ks[0], (d_model, 3 * d_model), jnp.float32)
                 / math.sqrt(d_model),
            bqkv=jax.random.normal(ks[1], (1, 3 * d_model), jnp.float32) * 0.02,
            wo=jax.random.normal(ks[2], (d_model, d_model), jnp.float32)
               / math.sqrt(d_model),
            bo=jax.random.normal(ks[3], (1, d_model), jnp.float32) * 0.02,
            g1=1.0 + jax.random.normal(ks[4], (1, d_model), jnp.float32) * 0.02,
            bln1=jax.random.normal(ks[5], (1, d_model), jnp.float32) * 0.02,
            w1=jax.random.normal(ks[6], (d_model, dim_feedforward), jnp.float32)
               / math.sqrt(d_model),
            bf1=jax.random.normal(ks[7], (1, dim_feedforward), jnp.float32) * 0.02,
            w2=jax.random.normal(ks[8], (dim_feedforward, d_model), jnp.float32)
               / math.sqrt(dim_feedforward),
            bf2=jax.random.normal(ks[9], (1, d_model), jnp.float32) * 0.02,
            g2=jnp.ones((1, d_model), jnp.float32),
            bln2=jnp.zeros((1, d_model), jnp.float32),
        ))
    return params


def _ln_ref(x, gamma, beta, eps=1e-5):
    mean = jnp.mean(x, axis=-1, keepdims=True)
    xc = x - mean
    var = jnp.mean(xc * xc, axis=-1, keepdims=True)
    return xc * jax.lax.rsqrt(var + eps) * gamma + beta


def reference_forward(src, mask, params, nhead):
    hp = jax.lax.Precision.HIGHEST
    b, s_len, d_model = src.shape
    head_dim = d_model // nhead
    scale = 1.0 / math.sqrt(head_dim)
    bias = jnp.where(mask, -1e30, 0.0).astype(jnp.float32)[:, None, None, :]
    x = src.astype(jnp.float32)
    for p in params:
        qkv = jnp.einsum('bsd,df->bsf', x, p["wqkv"], precision=hp) + p["bqkv"][0]
        q, k, v = jnp.split(qkv, 3, axis=-1)
        q = q.reshape(b, s_len, nhead, head_dim).transpose(0, 2, 1, 3) * scale
        k = k.reshape(b, s_len, nhead, head_dim).transpose(0, 2, 1, 3)
        v = v.reshape(b, s_len, nhead, head_dim).transpose(0, 2, 1, 3)
        sc = jnp.einsum('bhqe,bhke->bhqk', q, k, precision=hp) + bias
        a = jax.nn.softmax(sc, axis=-1)
        o = jnp.einsum('bhqk,bhke->bhqe', a, v, precision=hp)
        o = o.transpose(0, 2, 1, 3).reshape(b, s_len, d_model)
        o = jnp.einsum('bsd,de->bse', o, p["wo"], precision=hp) + p["bo"][0]
        y = _ln_ref(x + o, p["g1"][0], p["bln1"][0])
        f = jnp.maximum(
            jnp.einsum('bsd,df->bsf', y, p["w1"], precision=hp) + p["bf1"][0], 0.0)
        f = jnp.einsum('bsf,fd->bsd', f, p["w2"], precision=hp) + p["bf2"][0]
        x = _ln_ref(y + f, p["g2"][0], p["bln2"][0])
    return x


# ---------------------------------------------------------------------------
# Demo / self-check
# ---------------------------------------------------------------------------
if __name__ == "__main__":
    batch, seq, d_model, nhead, dim_ff, num_layers = 2, 8, 32, 4, 64, 2

    key = jax.random.PRNGKey(0)
    k_src, k_par = jax.random.split(key, 2)
    src = jax.random.normal(k_src, (batch, seq, d_model), jnp.float32)
    # key padding mask: True = padded position. Batch 0 unpadded; batch 1 pads tail.
    src_key_padding_mask = jnp.zeros((batch, seq), dtype=bool).at[1, 5:].set(True)

    params = init_params(k_par, num_layers, d_model, dim_ff)

    out = transformer_encoder_forward(src, src_key_padding_mask, params, nhead)
    out = jax.block_until_ready(out)

    ref = reference_forward(src, src_key_padding_mask, params, nhead)
    assert out.shape == (batch, seq, d_model)
    out_f32 = out.astype(jnp.float32)
    max_err = float(jnp.max(jnp.abs(out_f32 - ref)))
    # bf16 matmul operands vs f32 HIGHEST reference -> loosened tolerance.
    assert jnp.allclose(out_f32, ref, atol=5e-2, rtol=5e-2), f"max_err={max_err}"

    print("KERNEL_OK")
</pallas_src>

<mosaic_0001>
module attributes {stable_mosaic.version = 11 : i64} {
  func.func @_encoder_layer_kernel(%arg0: i32, %arg1: memref<1x8x32xbf16, #tpu.memory_space<vmem>>, %arg2: memref<1x1x8xf32, #tpu.memory_space<vmem>>, %arg3: memref<32x96xbf16, #tpu.memory_space<vmem>>, %arg4: memref<1x96xf32, #tpu.memory_space<vmem>>, %arg5: memref<32x32xbf16, #tpu.memory_space<vmem>>, %arg6: memref<1x32xf32, #tpu.memory_space<vmem>>, %arg7: memref<1x32xf32, #tpu.memory_space<vmem>>, %arg8: memref<1x32xf32, #tpu.memory_space<vmem>>, %arg9: memref<32x64xbf16, #tpu.memory_space<vmem>>, %arg10: memref<1x64xf32, #tpu.memory_space<vmem>>, %arg11: memref<64x32xbf16, #tpu.memory_space<vmem>>, %arg12: memref<1x32xf32, #tpu.memory_space<vmem>>, %arg13: memref<1x32xf32, #tpu.memory_space<vmem>>, %arg14: memref<1x32xf32, #tpu.memory_space<vmem>>, %arg15: memref<1x8x32xbf16, #tpu.memory_space<vmem>>, %arg16: memref<8x96xbf16, #tpu.memory_space<vmem>>, %arg17: memref<8x32xbf16, #tpu.memory_space<vmem>>) attributes {dimension_semantics = [#tpu.dimension_semantics<parallel>], iteration_bounds = array<i64: 2>, scalar_prefetch = 0 : i64, scratch_operands = 2 : i64, tpu.core_type = #tpu.core_type<tc>, window_params = [{transform_indices = @transform_0, window_bounds = array<i64: 1, 8, 32>}, {transform_indices = @transform_1, window_bounds = array<i64: 1, 1, 8>}, {pipeline_mode = #tpu.pipeline_mode<synchronous>, transform_indices = @transform_2, window_bounds = array<i64: 32, 96>}, {pipeline_mode = #tpu.pipeline_mode<synchronous>, transform_indices = @transform_3, window_bounds = array<i64: 1, 96>}, {pipeline_mode = #tpu.pipeline_mode<synchronous>, transform_indices = @transform_4, window_bounds = array<i64: 32, 32>}, {pipeline_mode = #tpu.pipeline_mode<synchronous>, transform_indices = @transform_5, window_bounds = array<i64: 1, 32>}, {pipeline_mode = #tpu.pipeline_mode<synchronous>, transform_indices = @transform_6, window_bounds = array<i64: 1, 32>}, {pipeline_mode = #tpu.pipeline_mode<synchronous>, transform_indices = @transform_7, window_bounds = array<i64: 1, 32>}, {pipeline_mode = #tpu.pipeline_mode<synchronous>, transform_indices = @transform_8, window_bounds = array<i64: 32, 64>}, {pipeline_mode = #tpu.pipeline_mode<synchronous>, transform_indices = @transform_9, window_bounds = array<i64: 1, 64>}, {pipeline_mode = #tpu.pipeline_mode<synchronous>, transform_indices = @transform_10, window_bounds = array<i64: 64, 32>}, {pipeline_mode = #tpu.pipeline_mode<synchronous>, transform_indices = @transform_11, window_bounds = array<i64: 1, 32>}, {pipeline_mode = #tpu.pipeline_mode<synchronous>, transform_indices = @transform_12, window_bounds = array<i64: 1, 32>}, {pipeline_mode = #tpu.pipeline_mode<synchronous>, transform_indices = @transform_13, window_bounds = array<i64: 1, 32>}, {transform_indices = @transform_14, window_bounds = array<i64: 1, 8, 32>}]} {
    %c0 = arith.constant 0 : index
    %c0_0 = arith.constant 0 : index
    %c0_1 = arith.constant 0 : index
    %0 = vector.load %arg1[%c0, %c0_0, %c0_1] : memref<1x8x32xbf16, #tpu.memory_space<vmem>>, vector<1x8x32xbf16>
    %1 = vector.shape_cast %0 : vector<1x8x32xbf16> to vector<8x32xbf16>
    %c0_2 = arith.constant 0 : index
    %c0_3 = arith.constant 0 : index
    %2 = vector.load %arg3[%c0_2, %c0_3] : memref<32x96xbf16, #tpu.memory_space<vmem>>, vector<32x96xbf16>
    %cst = arith.constant dense<0.000000e+00> : vector<8x96xf32>
    %3 = tpu.matmul %1, %2, %cst {dimension_numbers = #tpu.dot_dimension_numbers<[1], [0], [0], [1], [0, 0, 1, 1], [], []>} : vector<8x32xbf16>, vector<32x96xbf16>, vector<8x96xf32> -> vector<8x96xf32>
    %c0_4 = arith.constant 0 : index
    %c0_5 = arith.constant 0 : index
    %4 = vector.load %arg4[%c0_4, %c0_5] : memref<1x96xf32, #tpu.memory_space<vmem>>, vector<1x96xf32>
    %5 = vector.broadcast %4 : vector<1x96xf32> to vector<8x96xf32>
    %6 = arith.addf %3, %5 : vector<8x96xf32>
    %7 = arith.truncf %6 : vector<8x96xf32> to vector<8x96xbf16>
    %c0_6 = arith.constant 0 : index
    %c0_7 = arith.constant 0 : index
    %8 = vector.load %arg16[%c0_6, %c0_7] : memref<8x96xbf16, #tpu.memory_space<vmem>>, vector<8x96xbf16>
    tpu.vector_store %arg16[%c0_6, %c0_7], %7 {strides = array<i32>} : memref<8x96xbf16, #tpu.memory_space<vmem>>, vector<8x96xbf16>,
    %c0_8 = arith.constant 0 : index
    %c0_9 = arith.constant 0 : index
    %c0_10 = arith.constant 0 : index
    %9 = vector.load %arg2[%c0_8, %c0_9, %c0_10] : memref<1x1x8xf32, #tpu.memory_space<vmem>>, vector<1x1x8xf32>
    %10 = vector.shape_cast %9 : vector<1x1x8xf32> to vector<1x8xf32>
    %c0_11 = arith.constant 0 : index
    %c0_12 = arith.constant 0 : index
    %11 = vector.load %arg16[%c0_11, %c0_12] : memref<8x96xbf16, #tpu.memory_space<vmem>>, vector<8x8xbf16>
    %c0_13 = arith.constant 0 : index
    %c32 = arith.constant 32 : index
    %12 = vector.load %arg16[%c0_13, %c32] : memref<8x96xbf16, #tpu.memory_space<vmem>>, vector<8x8xbf16>
    %c0_14 = arith.constant 0 : index
    %c64 = arith.constant 64 : index
    %13 = vector.load %arg16[%c0_14, %c64] : memref<8x96xbf16, #tpu.memory_space<vmem>>, vector<8x8xbf16>
    %cst_15 = arith.constant dense<0.000000e+00> : vector<8x8xf32>
    %14 = tpu.matmul %11, %12, %cst_15 {dimension_numbers = #tpu.dot_dimension_numbers<[1], [1], [0], [0], [0, 0, 1, 0], [], []>} : vector<8x8xbf16>, vector<8x8xbf16>, vector<8x8xf32> -> vector<8x8xf32>
    %15 = vector.broadcast %10 : vector<1x8xf32> to vector<8x8xf32>
    %16 = arith.addf %14, %15 : vector<8x8xf32>
    %cst_16 = arith.constant dense<0xFF800000> : vector<8xf32>
    %17 = vector.multi_reduction <maximumf>, %16, %cst_16 [1] : vector<8x8xf32> to vector<8xf32>
    %18 = vector.shape_cast %17 : vector<8xf32> to vector<8x1xf32>
    %19 = vector.broadcast %18 : vector<8x1xf32> to vector<8x8xf32>
    %20 = arith.subf %16, %19 : vector<8x8xf32>
    %21 = math.exp %20 : vector<8x8xf32>
    %cst_17 = arith.constant dense<0.000000e+00> : vector<8xf32>
    %22 = vector.multi_reduction <add>, %21, %cst_17 [1] : vector<8x8xf32> to vector<8xf32>
    %23 = vector.shape_cast %22 : vector<8xf32> to vector<8x1xf32>
    %24 = tpu.reciprocal %23 {approx = true} : vector<8x1xf32> -> vector<8x1xf32>
    %25 = vector.broadcast %24 : vector<8x1xf32> to vector<8x8xf32>
    %26 = arith.mulf %21, %25 : vector<8x8xf32>
    %27 = arith.truncf %26 : vector<8x8xf32> to vector<8x8xbf16>
    %cst_18 = arith.constant dense<0.000000e+00> : vector<8x8xf32>
    %28 = tpu.matmul %27, %13, %cst_18 {dimension_numbers = #tpu.dot_dimension_numbers<[1], [0], [0], [1], [0, 0, 1, 1], [], []>} : vector<8x8xbf16>, vector<8x8xbf16>, vector<8x8xf32> -> vector<8x8xf32>
    %29 = arith.truncf %28 : vector<8x8xf32> to vector<8x8xbf16>
    %c0_19 = arith.constant 0 : index
    %c0_20 = arith.constant 0 : index
    %30 = vector.load %arg17[%c0_19, %c0_20] : memref<8x32xbf16, #tpu.memory_space<vmem>>, vector<8x8xbf16>
    tpu.vector_store %arg17[%c0_19, %c0_20], %29 {strides = array<i32>} : memref<8x32xbf16, #tpu.memory_space<vmem>>, vector<8x8xbf16>,
    %c0_21 = arith.constant 0 : index
    %c8 = arith.constant 8 : index
    %31 = vector.load %arg16[%c0_21, %c8] : memref<8x96xbf16, #tpu.memory_space<vmem>>, vector<8x8xbf16>
    %c0_22 = arith.constant 0 : index
    %c40 = arith.constant 40 : index
    %32 = vector.load %arg16[%c0_22, %c40] : memref<8x96xbf16, #tpu.memory_space<vmem>>, vector<8x8xbf16>
    %c0_23 = arith.constant 0 : index
    %c72 = arith.constant 72 : index
    %33 = vector.load %arg16[%c0_23, %c72] : memref<8x96xbf16, #tpu.memory_space<vmem>>, vector<8x8xbf16>
    %cst_24 = arith.constant dense<0.000000e+00> : vector<8x8xf32>
    %34 = tpu.matmul %31, %32, %cst_24 {dimension_numbers = #tpu.dot_dimension_numbers<[1], [1], [0], [0], [0, 0, 1, 0], [], []>} : vector<8x8xbf16>, vector<8x8xbf16>, vector<8x8xf32> -> vector<8x8xf32>
    %35 = vector.broadcast %10 : vector<1x8xf32> to vector<8x8xf32>
    %36 = arith.addf %34, %35 : vector<8x8xf32>
    %cst_25 = arith.constant dense<0xFF800000> : vector<8xf32>
    %37 = vector.multi_reduction <maximumf>, %36, %cst_25 [1] : vector<8x8xf32> to vector<8xf32>
    %38 = vector.shape_cast %37 : vector<8xf32> to vector<8x1xf32>
    %39 = vector.broadcast %38 : vector<8x1xf32> to vector<8x8xf32>
    %40 = arith.subf %36, %39 : vector<8x8xf32>
    %41 = math.exp %40 : vector<8x8xf32>
    %cst_26 = arith.constant dense<0.000000e+00> : vector<8xf32>
    %42 = vector.multi_reduction <add>, %41, %cst_26 [1] : vector<8x8xf32> to vector<8xf32>
    %43 = vector.shape_cast %42 : vector<8xf32> to vector<8x1xf32>
    %44 = tpu.reciprocal %43 {approx = true} : vector<8x1xf32> -> vector<8x1xf32>
    %45 = vector.broadcast %44 : vector<8x1xf32> to vector<8x8xf32>
    %46 = arith.mulf %41, %45 : vector<8x8xf32>
    %47 = arith.truncf %46 : vector<8x8xf32> to vector<8x8xbf16>
    %cst_27 = arith.constant dense<0.000000e+00> : vector<8x8xf32>
    %48 = tpu.matmul %47, %33, %cst_27 {dimension_numbers = #tpu.dot_dimension_numbers<[1], [0], [0], [1], [0, 0, 1, 1], [], []>} : vector<8x8xbf16>, vector<8x8xbf16>, vector<8x8xf32> -> vector<8x8xf32>
    %49 = arith.truncf %48 : vector<8x8xf32> to vector<8x8xbf16>
    %c0_28 = arith.constant 0 : index
    %c8_29 = arith.constant 8 : index
    %50 = vector.load %arg17[%c0_28, %c8_29] : memref<8x32xbf16, #tpu.memory_space<vmem>>, vector<8x8xbf16>
    tpu.vector_store %arg17[%c0_28, %c8_29], %49 {strides = array<i32>} : memref<8x32xbf16, #tpu.memory_space<vmem>>, vector<8x8xbf16>,
    %c0_30 = arith.constant 0 : index
    %c16 = arith.constant 16 : index
    %51 = vector.load %arg16[%c0_30, %c16] : memref<8x96xbf16, #tpu.memory_space<vmem>>, vector<8x8xbf16>
    %c0_31 = arith.constant 0 : index
    %c48 = arith.constant 48 : index
    %52 = vector.load %arg16[%c0_31, %c48] : memref<8x96xbf16, #tpu.memory_space<vmem>>, vector<8x8xbf16>
    %c0_32 = arith.constant 0 : index
    %c80 = arith.constant 80 : index
    %53 = vector.load %arg16[%c0_32, %c80] : memref<8x96xbf16, #tpu.memory_space<vmem>>, vector<8x8xbf16>
    %cst_33 = arith.constant dense<0.000000e+00> : vector<8x8xf32>
    %54 = tpu.matmul %51, %52, %cst_33 {dimension_numbers = #tpu.dot_dimension_numbers<[1], [1], [0], [0], [0, 0, 1, 0], [], []>} : vector<8x8xbf16>, vector<8x8xbf16>, vector<8x8xf32> -> vector<8x8xf32>
    %55 = vector.broadcast %10 : vector<1x8xf32> to vector<8x8xf32>
    %56 = arith.addf %54, %55 : vector<8x8xf32>
    %cst_34 = arith.constant dense<0xFF800000> : vector<8xf32>
    %57 = vector.multi_reduction <maximumf>, %56, %cst_34 [1] : vector<8x8xf32> to vector<8xf32>
    %58 = vector.shape_cast %57 : vector<8xf32> to vector<8x1xf32>
    %59 = vector.broadcast %58 : vector<8x1xf32> to vector<8x8xf32>
    %60 = arith.subf %56, %59 : vector<8x8xf32>
    %61 = math.exp %60 : vector<8x8xf32>
    %cst_35 = arith.constant dense<0.000000e+00> : vector<8xf32>
    %62 = vector.multi_reduction <add>, %61, %cst_35 [1] : vector<8x8xf32> to vector<8xf32>
    %63 = vector.shape_cast %62 : vector<8xf32> to vector<8x1xf32>
    %64 = tpu.reciprocal %63 {approx = true} : vector<8x1xf32> -> vector<8x1xf32>
    %65 = vector.broadcast %64 : vector<8x1xf32> to vector<8x8xf32>
    %66 = arith.mulf %61, %65 : vector<8x8xf32>
    %67 = arith.truncf %66 : vector<8x8xf32> to vector<8x8xbf16>
    %cst_36 = arith.constant dense<0.000000e+00> : vector<8x8xf32>
    %68 = tpu.matmul %67, %53, %cst_36 {dimension_numbers = #tpu.dot_dimension_numbers<[1], [0], [0], [1], [0, 0, 1, 1], [], []>} : vector<8x8xbf16>, vector<8x8xbf16>, vector<8x8xf32> -> vector<8x8xf32>
    %69 = arith.truncf %68 : vector<8x8xf32> to vector<8x8xbf16>
    %c0_37 = arith.constant 0 : index
    %c16_38 = arith.constant 16 : index
    %70 = vector.load %arg17[%c0_37, %c16_38] : memref<8x32xbf16, #tpu.memory_space<vmem>>, vector<8x8xbf16>
    tpu.vector_store %arg17[%c0_37, %c16_38], %69 {strides = array<i32>} : memref<8x32xbf16, #tpu.memory_space<vmem>>, vector<8x8xbf16>,
    %c0_39 = arith.constant 0 : index
    %c24 = arith.constant 24 : index
    %71 = vector.load %arg16[%c0_39, %c24] : memref<8x96xbf16, #tpu.memory_space<vmem>>, vector<8x8xbf16>
    %c0_40 = arith.constant 0 : index
    %c56 = arith.constant 56 : index
    %72 = vector.load %arg16[%c0_40, %c56] : memref<8x96xbf16, #tpu.memory_space<vmem>>, vector<8x8xbf16>
    %c0_41 = arith.constant 0 : index
    %c88 = arith.constant 88 : index
    %73 = vector.load %arg16[%c0_41, %c88] : memref<8x96xbf16, #tpu.memory_space<vmem>>, vector<8x8xbf16>
    %cst_42 = arith.constant dense<0.000000e+00> : vector<8x8xf32>
    %74 = tpu.matmul %71, %72, %cst_42 {dimension_numbers = #tpu.dot_dimension_numbers<[1], [1], [0], [0], [0, 0, 1, 0], [], []>} : vector<8x8xbf16>, vector<8x8xbf16>, vector<8x8xf32> -> vector<8x8xf32>
    %75 = vector.broadcast %10 : vector<1x8xf32> to vector<8x8xf32>
    %76 = arith.addf %74, %75 : vector<8x8xf32>
    %cst_43 = arith.constant dense<0xFF800000> : vector<8xf32>
    %77 = vector.multi_reduction <maximumf>, %76, %cst_43 [1] : vector<8x8xf32> to vector<8xf32>
    %78 = vector.shape_cast %77 : vector<8xf32> to vector<8x1xf32>
    %79 = vector.broadcast %78 : vector<8x1xf32> to vector<8x8xf32>
    %80 = arith.subf %76, %79 : vector<8x8xf32>
    %81 = math.exp %80 : vector<8x8xf32>
    %cst_44 = arith.constant dense<0.000000e+00> : vector<8xf32>
    %82 = vector.multi_reduction <add>, %81, %cst_44 [1] : vector<8x8xf32> to vector<8xf32>
    %83 = vector.shape_cast %82 : vector<8xf32> to vector<8x1xf32>
    %84 = tpu.reciprocal %83 {approx = true} : vector<8x1xf32> -> vector<8x1xf32>
    %85 = vector.broadcast %84 : vector<8x1xf32> to vector<8x8xf32>
    %86 = arith.mulf %81, %85 : vector<8x8xf32>
    %87 = arith.truncf %86 : vector<8x8xf32> to vector<8x8xbf16>
    %cst_45 = arith.constant dense<0.000000e+00> : vector<8x8xf32>
    %88 = tpu.matmul %87, %73, %cst_45 {dimension_numbers = #tpu.dot_dimension_numbers<[1], [0], [0], [1], [0, 0, 1, 1], [], []>} : vector<8x8xbf16>, vector<8x8xbf16>, vector<8x8xf32> -> vector<8x8xf32>
    %89 = arith.truncf %88 : vector<8x8xf32> to vector<8x8xbf16>
    %c0_46 = arith.constant 0 : index
    %c24_47 = arith.constant 24 : index
    %90 = vector.load %arg17[%c0_46, %c24_47] : memref<8x32xbf16, #tpu.memory_space<vmem>>, vector<8x8xbf16>
    tpu.vector_store %arg17[%c0_46, %c24_47], %89 {strides = array<i32>} : memref<8x32xbf16, #tpu.memory_space<vmem>>, vector<8x8xbf16>,
    %c0_48 = arith.constant 0 : index
    %c0_49 = arith.constant 0 : index
    %91 = vector.load %arg17[%c0_48, %c0_49] : memref<8x32xbf16, #tpu.memory_space<vmem>>, vector<8x32xbf16>
    %c0_50 = arith.constant 0 : index
    %c0_51 = arith.constant 0 : index
    %92 = vector.load %arg5[%c0_50, %c0_51] : memref<32x32xbf16, #tpu.memory_space<vmem>>, vector<32x32xbf16>
    %cst_52 = arith.constant dense<0.000000e+00> : vector<8x32xf32>
    %93 = tpu.matmul %91, %92, %cst_52 {dimension_numbers = #tpu.dot_dimension_numbers<[1], [0], [0], [1], [0, 0, 1, 1], [], []>} : vector<8x32xbf16>, vector<32x32xbf16>, vector<8x32xf32> -> vector<8x32xf32>
    %c0_53 = arith.constant 0 : index
    %c0_54 = arith.constant 0 : index
    %94 = vector.load %arg6[%c0_53, %c0_54] : memref<1x32xf32, #tpu.memory_space<vmem>>, vector<1x32xf32>
    %95 = vector.broadcast %94 : vector<1x32xf32> to vector<8x32xf32>
    %96 = arith.addf %93, %95 : vector<8x32xf32>
    %97 = arith.extf %1 : vector<8x32xbf16> to vector<8x32xf32>
    %98 = arith.addf %97, %96 : vector<8x32xf32>
    %c0_55 = arith.constant 0 : index
    %c0_56 = arith.constant 0 : index
    %99 = vector.load %arg7[%c0_55, %c0_56] : memref<1x32xf32, #tpu.memory_space<vmem>>, vector<1x32xf32>
    %c0_57 = arith.constant 0 : index
    %c0_58 = arith.constant 0 : index
    %100 = vector.load %arg8[%c0_57, %c0_58] : memref<1x32xf32, #tpu.memory_space<vmem>>, vector<1x32xf32>
    %cst_59 = arith.constant dense<0.000000e+00> : vector<8xf32>
    %101 = vector.multi_reduction <add>, %98, %cst_59 [1] : vector<8x32xf32> to vector<8xf32>
    %102 = vector.shape_cast %101 : vector<8xf32> to vector<8x1xf32>
    %cst_60 = arith.constant 3.200000e+01 : f32
    %103 = vector.broadcast %cst_60 : f32 to vector<8x1xf32>
    %104 = arith.divf %102, %103 : vector<8x1xf32>
    %105 = vector.broadcast %104 : vector<8x1xf32> to vector<8x32xf32>
    %106 = arith.subf %98, %105 : vector<8x32xf32>
    %107 = arith.mulf %106, %106 : vector<8x32xf32>
    %cst_61 = arith.constant dense<0.000000e+00> : vector<8xf32>
    %108 = vector.multi_reduction <add>, %107, %cst_61 [1] : vector<8x32xf32> to vector<8xf32>
    %109 = vector.shape_cast %108 : vector<8xf32> to vector<8x1xf32>
    %cst_62 = arith.constant 3.200000e+01 : f32
    %110 = vector.broadcast %cst_62 : f32 to vector<8x1xf32>
    %111 = arith.divf %109, %110 : vector<8x1xf32>
    %cst_63 = arith.constant 9.99999974E-6 : f32
    %112 = vector.broadcast %cst_63 : f32 to vector<8x1xf32>
    %113 = arith.addf %111, %112 : vector<8x1xf32>
    %114 = math.rsqrt %113 : vector<8x1xf32>
    %115 = vector.broadcast %114 : vector<8x1xf32> to vector<8x32xf32>
    %116 = arith.mulf %106, %115 : vector<8x32xf32>
    %117 = vector.broadcast %99 : vector<1x32xf32> to vector<8x32xf32>
    %118 = arith.mulf %116, %117 : vector<8x32xf32>
    %119 = vector.broadcast %100 : vector<1x32xf32> to vector<8x32xf32>
    %120 = arith.addf %118, %119 : vector<8x32xf32>
    %121 = arith.truncf %120 : vector<8x32xf32> to vector<8x32xbf16>
    %c0_64 = arith.constant 0 : index
    %c0_65 = arith.constant 0 : index
    %122 = vector.load %arg9[%c0_64, %c0_65] : memref<32x64xbf16, #tpu.memory_space<vmem>>, vector<32x64xbf16>
    %cst_66 = arith.constant dense<0.000000e+00> : vector<8x64xf32>
    %123 = tpu.matmul %121, %122, %cst_66 {dimension_numbers = #tpu.dot_dimension_numbers<[1], [0], [0], [1], [0, 0, 1, 1], [], []>} : vector<8x32xbf16>, vector<32x64xbf16>, vector<8x64xf32> -> vector<8x64xf32>
    %c0_67 = arith.constant 0 : index
    %c0_68 = arith.constant 0 : index
    %124 = vector.load %arg10[%c0_67, %c0_68] : memref<1x64xf32, #tpu.memory_space<vmem>>, vector<1x64xf32>
    %125 = vector.broadcast %124 : vector<1x64xf32> to vector<8x64xf32>
    %126 = arith.addf %123, %125 : vector<8x64xf32>
    %cst_69 = arith.constant 0.000000e+00 : f32
    %127 = vector.broadcast %cst_69 : f32 to vector<8x64xf32>
    %128 = arith.maximumf %126, %127 : vector<8x64xf32>
    %129 = arith.truncf %128 : vector<8x64xf32> to vector<8x64xbf16>
    %c0_70 = arith.constant 0 : index
    %c0_71 = arith.constant 0 : index
    %130 = vector.load %arg11[%c0_70, %c0_71] : memref<64x32xbf16, #tpu.memory_space<vmem>>, vector<64x32xbf16>
    %cst_72 = arith.constant dense<0.000000e+00> : vector<8x32xf32>
    %131 = tpu.matmul %129, %130, %cst_72 {dimension_numbers = #tpu.dot_dimension_numbers<[1], [0], [0], [1], [0, 0, 1, 1], [], []>} : vector<8x64xbf16>, vector<64x32xbf16>, vector<8x32xf32> -> vector<8x32xf32>
    %c0_73 = arith.constant 0 : index
    %c0_74 = arith.constant 0 : index
    %132 = vector.load %arg12[%c0_73, %c0_74] : memref<1x32xf32, #tpu.memory_space<vmem>>, vector<1x32xf32>
    %133 = vector.broadcast %132 : vector<1x32xf32> to vector<8x32xf32>
    %134 = arith.addf %131, %133 : vector<8x32xf32>
    %135 = arith.addf %120, %134 : vector<8x32xf32>
    %c0_75 = arith.constant 0 : index
    %c0_76 = arith.constant 0 : index
    %136 = vector.load %arg13[%c0_75, %c0_76] : memref<1x32xf32, #tpu.memory_space<vmem>>, vector<1x32xf32>
    %c0_77 = arith.constant 0 : index
    %c0_78 = arith.constant 0 : index
    %137 = vector.load %arg14[%c0_77, %c0_78] : memref<1x32xf32, #tpu.memory_space<vmem>>, vector<1x32xf32>
    %cst_79 = arith.constant dense<0.000000e+00> : vector<8xf32>
    %138 = vector.multi_reduction <add>, %135, %cst_79 [1] : vector<8x32xf32> to vector<8xf32>
    %139 = vector.shape_cast %138 : vector<8xf32> to vector<8x1xf32>
    %cst_80 = arith.constant 3.200000e+01 : f32
    %140 = vector.broadcast %cst_80 : f32 to vector<8x1xf32>
    %141 = arith.divf %139, %140 : vector<8x1xf32>
    %142 = vector.broadcast %141 : vector<8x1xf32> to vector<8x32xf32>
    %143 = arith.subf %135, %142 : vector<8x32xf32>
    %144 = arith.mulf %143, %143 : vector<8x32xf32>
    %cst_81 = arith.constant dense<0.000000e+00> : vector<8xf32>
    %145 = vector.multi_reduction <add>, %144, %cst_81 [1] : vector<8x32xf32> to vector<8xf32>
    %146 = vector.shape_cast %145 : vector<8xf32> to vector<8x1xf32>
    %cst_82 = arith.constant 3.200000e+01 : f32
    %147 = vector.broadcast %cst_82 : f32 to vector<8x1xf32>
    %148 = arith.divf %146, %147 : vector<8x1xf32>
    %cst_83 = arith.constant 9.99999974E-6 : f32
    %149 = vector.broadcast %cst_83 : f32 to vector<8x1xf32>
    %150 = arith.addf %148, %149 : vector<8x1xf32>
    %151 = math.rsqrt %150 : vector<8x1xf32>
    %152 = vector.broadcast %151 : vector<8x1xf32> to vector<8x32xf32>
    %153 = arith.mulf %143, %152 : vector<8x32xf32>
    %154 = vector.broadcast %136 : vector<1x32xf32> to vector<8x32xf32>
    %155 = arith.mulf %153, %154 : vector<8x32xf32>
    %156 = vector.broadcast %137 : vector<1x32xf32> to vector<8x32xf32>
    %157 = arith.addf %155, %156 : vector<8x32xf32>
    %158 = arith.truncf %157 : vector<8x32xf32> to vector<8x32xbf16>
    %c0_84 = arith.constant 0 : index
    %c0_85 = arith.constant 0 : index
    %c0_86 = arith.constant 0 : index
    %159 = vector.load %arg15[%c0_84, %c0_85, %c0_86] : memref<1x8x32xbf16, #tpu.memory_space<vmem>>, vector<1x8x32xbf16>
    %160 = vector.shape_cast %159 : vector<1x8x32xbf16> to vector<8x32xbf16>
    %161 = vector.shape_cast %158 : vector<8x32xbf16> to vector<1x8x32xbf16>
    tpu.vector_store %arg15[%c0_84, %c0_85, %c0_86], %161 {strides = array<i32>} : memref<1x8x32xbf16, #tpu.memory_space<vmem>>, vector<1x8x32xbf16>,
    return
  }
  func.func @transform_0(%arg0: i32) -> (i32, i32, i32) {
    %c0_i32 = arith.constant 0 : i32
    %c0_i32_0 = arith.constant 0 : i32
    %c0_i32_1 = arith.constant 0 : i32
    return %arg0, %c0_i32, %c0_i32_0 : i32, i32, i32
  }
  func.func @transform_1(%arg0: i32) -> (i32, i32, i32) {
    %c0_i32 = arith.constant 0 : i32
    %c0_i32_0 = arith.constant 0 : i32
    %c0_i32_1 = arith.constant 0 : i32
    return %arg0, %c0_i32, %c0_i32_0 : i32, i32, i32
  }
  func.func @transform_2(%arg0: i32) -> (i32, i32) {
    %c0_i32 = arith.constant 0 : i32
    %c0_i32_0 = arith.constant 0 : i32
    %c0_i32_1 = arith.constant 0 : i32
    return %c0_i32, %c0_i32_0 : i32, i32
  }
  func.func @transform_3(%arg0: i32) -> (i32, i32) {
    %c0_i32 = arith.constant 0 : i32
    %c0_i32_0 = arith.constant 0 : i32
    %c0_i32_1 = arith.constant 0 : i32
    return %c0_i32, %c0_i32_0 : i32, i32
  }
  func.func @transform_4(%arg0: i32) -> (i32, i32) {
    %c0_i32 = arith.constant 0 : i32
    %c0_i32_0 = arith.constant 0 : i32
    %c0_i32_1 = arith.constant 0 : i32
    return %c0_i32, %c0_i32_0 : i32, i32
  }
  func.func @transform_5(%arg0: i32) -> (i32, i32) {
    %c0_i32 = arith.constant 0 : i32
    %c0_i32_0 = arith.constant 0 : i32
    %c0_i32_1 = arith.constant 0 : i32
    return %c0_i32, %c0_i32_0 : i32, i32
  }
  func.func @transform_6(%arg0: i32) -> (i32, i32) {
    %c0_i32 = arith.constant 0 : i32
    %c0_i32_0 = arith.constant 0 : i32
    %c0_i32_1 = arith.constant 0 : i32
    return %c0_i32, %c0_i32_0 : i32, i32
  }
  func.func @transform_7(%arg0: i32) -> (i32, i32) {
    %c0_i32 = arith.constant 0 : i32
    %c0_i32_0 = arith.constant 0 : i32
    %c0_i32_1 = arith.constant 0 : i32
    return %c0_i32, %c0_i32_0 : i32, i32
  }
  func.func @transform_8(%arg0: i32) -> (i32, i32) {
    %c0_i32 = arith.constant 0 : i32
    %c0_i32_0 = arith.constant 0 : i32
    %c0_i32_1 = arith.constant 0 : i32
    return %c0_i32, %c0_i32_0 : i32, i32
  }
  func.func @transform_9(%arg0: i32) -> (i32, i32) {
    %c0_i32 = arith.constant 0 : i32
    %c0_i32_0 = arith.constant 0 : i32
    %c0_i32_1 = arith.constant 0 : i32
    return %c0_i32, %c0_i32_0 : i32, i32
  }
  func.func @transform_10(%arg0: i32) -> (i32, i32) {
    %c0_i32 = arith.constant 0 : i32
    %c0_i32_0 = arith.constant 0 : i32
    %c0_i32_1 = arith.constant 0 : i32
    return %c0_i32, %c0_i32_0 : i32, i32
  }
  func.func @transform_11(%arg0: i32) -> (i32, i32) {
    %c0_i32 = arith.constant 0 : i32
    %c0_i32_0 = arith.constant 0 : i32
    %c0_i32_1 = arith.constant 0 : i32
    return %c0_i32, %c0_i32_0 : i32, i32
  }
  func.func @transform_12(%arg0: i32) -> (i32, i32) {
    %c0_i32 = arith.constant 0 : i32
    %c0_i32_0 = arith.constant 0 : i32
    %c0_i32_1 = arith.constant 0 : i32
    return %c0_i32, %c0_i32_0 : i32, i32
  }
  func.func @transform_13(%arg0: i32) -> (i32, i32) {
    %c0_i32 = arith.constant 0 : i32
    %c0_i32_0 = arith.constant 0 : i32
    %c0_i32_1 = arith.constant 0 : i32
    return %c0_i32, %c0_i32_0 : i32, i32
  }
  func.func @transform_14(%arg0: i32) -> (i32, i32, i32) {
    %c0_i32 = arith.constant 0 : i32
    %c0_i32_0 = arith.constant 0 : i32
    %c0_i32_1 = arith.constant 0 : i32
    return %arg0, %c0_i32, %c0_i32_0 : i32, i32, i32
  }
}

</mosaic_0001>

<bundles_post_ra>
// kernel: tpu_custom_call.1
= control target key start
LH: loop header
LB: loop body
LE: loop exit
PB: predicated region body
PF: predicated region fallthrough
CT: control target
= control target key end

     0   :  { %s1807_s0 = inlined_call_operand.hbm [shape: bf16[2,8,32], index: 0, kind: input, shape index: {}]   ;;  %s1808_s1 = inlined_call_operand.hbm [shape: f32[2,1,8], index: 1, kind: input, shape index: {}]   ;;  %s1809_s2 = inlined_call_operand.vmem [shape: bf16[32,96], index: 2, kind: input, shape index: {}]   ;;  %s1810_s3 = inlined_call_operand.vmem [shape: f32[1,96], index: 3, kind: input, shape index: {}]   ;;  %s1811_s4 = inlined_call_operand.vmem [shape: bf16[32,32], index: 4, kind: input, shape index: {}]   ;;  %s1812_s5 = inlined_call_operand.vmem [shape: f32[1,32], index: 5, kind: input, shape index: {}]   ;;  %s1813_s6 = inlined_call_operand.vmem [shape: f32[1,32], index: 6, kind: input, shape index: {}]   ;;  %s1814_s7 = inlined_call_operand.vmem [shape: f32[1,32], index: 7, kind: input, shape index: {}]   ;;  %s1815_s8 = inlined_call_operand.vmem [shape: bf16[32,64], index: 8, kind: input, shape index: {}]   ;;  %s1816_s9 = inlined_call_operand.vmem [shape: f32[1,64], index: 9, kind: input, shape index: {}]   ;;  %s1817_s10 = inlined_call_operand.vmem [shape: bf16[64,32], index: 10, kind: input, shape index: {}]   ;;  %s1818_s11 = inlined_call_operand.vmem [shape: f32[1,32], index: 11, kind: input, shape index: {}]   ;;  %s1819_s12 = inlined_call_operand.vmem [shape: f32[1,32], index: 12, kind: input, shape index: {}]   ;;  %s1820_s13 = inlined_call_operand.vmem [shape: f32[1,32], index: 13, kind: input, shape index: {}]   ;;  %s1821_s14 = inlined_call_operand.hbm [shape: bf16[2,8,32], index: 14, kind: output, shape index: {}]  }
   0x1   :  { %1830 = sst [smem:[#allocation19_spill]] %s1807_s0 }
   0x2   :  { %1831 = sst [smem:[#allocation20_spill]] %s1820_s13 }
   0x3   :  { %1832 = sst [smem:[#allocation21_spill]] %s1821_s14 }
   0x4   :  { %19 = vsyncpa [#allocation5], 0 }
   0x5   :  { %21 = vsyncpa [#allocation5 + $0x1], 0 }
   0x6   :  { %22 = vsyncpa [#allocation8], 0 }
   0x7   :  { %24 = vsyncpa [#allocation8 + $0x1], 0 }
   0x8   :  { %25 = vsyncpa [#allocation6], 0 }
   0x9   :  { %27 = vsyncpa [#allocation6 + $0x1], 0  ;;  %s1534_s29 = smov 0   ;;  %s1536_s30 = smov 0  }
   0xa   :  { %s1538_s15 = smov 0   ;;  %s1540_s16 = smov 0  }
   0xb LB: > { %1833 = sst [smem:[#allocation13_spill]] %s1430_s29  ;;  %s1555_s17 = sadd.s32 4294967295, %s1442_s16   ;;  %s1442_s16 = sphi %s1540_s16, %s1852_s16   ;;  %s1438_s15 = sphi %s1538_s15, %s1854_s15   ;;  %s1434_s30 = sphi %s1536_s30, %s1856_s30   ;;  %s1430_s29 = sphi %s1534_s29, %s1855_s29  }
   0xc   : > { %1834 = sst [smem:[#allocation14_spill]] %s1438_s15  ;;  %s1141_s18 = sadd.s32 4294967294, %s1442_s16  }
   0xd   : > { %s1559_s19 = sadd.s32 1, %s1442_s16   ;;  %s40_s20 = sadd.s32 1, %s1438_s15 }
   0xe   : > { %1835 = sst [smem:[#allocation15_spill]] %s1559_s19  ;;  %s37_s21 = ssub.s32 %s1442_s16, %s1559_s19 }
   0xf   : > { %p47_p0 = scmp.ne.s32.totalorder %s1438_s15, %s1434_s30  ;;  %p38_p1 = scmp.eq.s32.totalorder %s37_s21, 0 }
  0x10   : > { %p48_p2 = scmp.eq.s32.totalorder %s1442_s16, 0  ;;  %p53_p3 = scmp.ne.s32.totalorder %s1434_s30, %s1430_s29 }
  0x11   : > { %p54_p4 = scmp.eq.s32.totalorder %s1555_s17, 0  ;;  %p355_p7 = scmp.eq.s32.totalorder %s1555_s17, 1 }
  0x12   : > { %s1571_s22 = scalar_select %p38_p1, %s1438_s15, %s40_s20  }
  0x13   : > { %p1573_p5 = por %p48_p2, %p47_p0  ;;  %p1577_p6 = por %p54_p4, %p53_p3 }
  0x14   : > { %1836 = sst [smem:[#allocation16_spill]] %s1571_s22  ;;  %p361_p8 = scmp.eq.s32.totalorder %s1141_s18, 1 }
  0x15   : > { %p1232_p10 = scmp.lt.s32.totalorder %s1442_s16, 2  ;;  %p1584_p11 = por %p355_p7, %p47_p0 }
  0x16   : > { %p1588_p12 = por %p361_p8, %p53_p3  ;;  %s1593_s27 = sand.u32 1, %s1438_s15  }
  0x17   : > { %s1839_s25 = scalar_select %p1584_p11, 1, 0 }
  0x18   : > { %s1841_s26 = scalar_select %p1588_p12, 1, 0 }
  0x19   : > { %1840 = sst [smem:[#allocation17_spill]] %s1839_s25  ;;  %s1145_s28 = sshll.u32 %s1442_s16, 2 }
  0x1a   : > { %1842 = sst [smem:[#allocation18_spill]] %s1841_s26  ;;  %s1144_s20 = sshll.u32 %s1593_s27, 2 }
  0x1b   : > { %s1843_s0 = sld [smem:[#allocation19_spill]]  ;;  %s421_s29 = scalar_lea.vmem [#allocation4], %s1144_s20 }
  0x1c   : > { %s429_s14 = sshll.u32 %s421_s29, 4  ;;  %p1602_p13 = pnand %p1232_p10, %p1573_p5  ;;  %s430_s14 = int_to_ptr.vmem [resolvable:$true] %s429_s14 }
  0x1d   : > { %p1146_p0 = scmp.ge.s32.totalorder %s1442_s16, 1  ;;  %p451_p1 = scmp.lt.s32.totalorder %s1442_s16, 3 }
  0x1e   : > { %s418_s15 = scalar_lea.sflag [#allocation5], %s1593_s27  ;;  %p1316_p3 = pneg %p1602_p13 }
  0x21   : > { %s425_s18 = scalar_lea.hbm %s1843_s0, %s1145_s28  ;;  %s1319_s23 = scalar_lea.hbm %s1843_s0, 8 }
  0x22   : > { %s427_s19 = sshll.u32 %s425_s18, 4  ;;  %s428_s19 = int_to_ptr.hbm [resolvable:$true] %s427_s19 }
  0x23   : > { %s1312_s26 = sshra.s32 %s428_s19, 4  ;;  %s1313_s26 = int_to_ptr.hbm [resolvable:$true] %s1312_s26 }
  0x24   : > { %s1314_s13 = scalar_lea.hbm %s1313_s26, 4  ;;  %p1320_p5 = scmp.lt.s32.totalorder %s1313_s26, %s1843_s0 }
  0x25   : > { %p1315_p2 = scmp.ne.s32.totalorder %s1313_s26, %s1314_s13  ;;  %p1321_p8 = scmp.lt.s32.totalorder %s1319_s23, %s1314_s13 }
  0x27   : > { %p1317_p4 = pnand %p1316_p3, %p1315_p2  ;;  %p1322_p10 = por %p1321_p8, %p1320_p5 }
  0x29   : > { %p1318_p7 = pneg %p1317_p4 }
  0x2b   : > { %p1323_p9 = pnand %p1322_p10, %p1318_p7 }
  0x2d   : > { %1326 = shalt.err (!%p1323_p9)
}
  0x2e   : > { %1224 = dma.hbm_to_vmem [thread:$0]  (!%p1602_p13), %s428_s19, 64, %s430_s14, %s418_s15  }
  0x2f   : > { %p1626_p2 = pnand %p1146_p0, %p451_p1  ;;  %s442_s18 = scalar_lea.hbm %s1808_s1, %s1442_s16 }
  0x30   : > { %s444_s29 = sshll.u32 %s442_s18, 4  ;;  %s439_s22 = scalar_lea.vmem [#allocation7], %s1593_s27  ;;  %s445_s29 = int_to_ptr.hbm [resolvable:$true] %s444_s29 }
  0x31   : > { %s446_s23 = sshll.u32 %s439_s22, 4  ;;  %s437_s28 = scalar_lea.sflag [#allocation8], %s1593_s27  ;;  %s447_s23 = int_to_ptr.vmem [resolvable:$true] %s446_s23 }
  0x32   : > { %s1342_s20 = sshra.s32 %s445_s29, 4  ;;  %s1349_s19 = scalar_lea.hbm %s1808_s1, 2  ;;  %s1343_s20 = int_to_ptr.hbm [resolvable:$true] %s1342_s20 }
  0x33   : > { %s1344_s0 = scalar_lea.hbm %s1343_s20, 1  ;;  %p1350_p4 = scmp.lt.s32.totalorder %s1343_s20, %s1808_s1 }
  0x34   : > { %p1345_p9 = scmp.ne.s32.totalorder %s1343_s20, %s1344_s0  ;;  %p1351_p7 = scmp.lt.s32.totalorder %s1349_s19, %s1344_s0 }
  0x36   : > { %p1347_p0 = pnand %p1345_p9, %p1316_p3  ;;  %p1352_p5 = por %p1351_p7, %p1350_p4 }
  0x38   : > { %p1348_p1 = pneg %p1347_p0 }
  0x3a   : > { %p1353_p8 = pnand %p1352_p5, %p1348_p1 }
  0x3c   : > { %1356 = shalt.err (!%p1353_p8)
}
  0x3d   : > { %1227 = dma.hbm_to_vmem [thread:$0]  (!%p1602_p13), %s445_s29, 16, %s447_s23, %s437_s28  }
  0x3e   : > { %455 = sbr.rel (%p1626_p2) target bundleno = 1973 (0x7b5), region = 76  ;;  %s1650_s27 = sand.u32 (!%p1626_p2), 1, %s1434_s30  }
  0x3f   : > { %s1147_s18 = sshll.u32 (!%p1626_p2), %s1650_s27, 2  ;;  %s458_s22 = scalar_lea.sflag (!%p1626_p2), [#allocation5], %s1650_s27 }
  0x40   : > { %s461_s0 = scalar_lea.vmem (!%p1626_p2), [#allocation4], %s1147_s18 }
  0x43   : > { %1417 = dma.done.wait (%p1577_p6), %s458_s22, 64  }
  0x44   : > { %1419 = vsyncadd (%p1577_p6), %s458_s22, 4294967232  ;;  %s468_s25 = scalar_lea.sflag [#allocation8], %s1650_s27  ;;  %s470_s21 = scalar_lea.vmem [#allocation7], %s1650_s27 }
  0x45   : > { %1421 = dma.done.wait (%p1577_p6), %s468_s25, 16  }
  0x46   : > { %1423 = vsyncadd (%p1577_p6), %s468_s25, 4294967280  ;;  %v1206_v0 = vld [vmem:[%s1809_s2 + $0x8] sm:$0xff]  ;;  %v1205_v1 = vld [vmem:[%s1809_s2] sm:$0xff]  ;;  %vm542_vm0 = vcmask 261120   ;;  %vm560_vm1 = vcmask 781312   ;;  %s1444_s24 = smov 104  }
  0x47   : > { %552 = vmatpush.bf16.msra.mxu0 %v1206_v0  ;;  %v1672_v2 = vld [vmem:[%s461_s0] sm:$0xf]  ;;  %v1281_v3 = vld [vmem:[%s1810_s3] ss:$0 sm:$0xff]  ;;  %s1445_s19 = smov 120   ;;  %s1446_s26 = smov 96  }
  0x48   : > { %s1447_s13 = smov 80   ;;  %s1448_s22 = smov 72   ;;  %vm572_vm2 = vcmask 64512   ;;  %v1282_v31 = vld [vmem:[%s470_s21] ss:$0 sm:$0xff]  ;;  %vm609_vm3 = vcmask 1043456  }
  0x49   : > { %s1449_s0 = smov 88   ;;  %s1450_s25 = smov 112   ;;  %vm627_vm4 = vcmask 60416   ;;  %vm694_vm5 = vcmask 126016   ;;  %vm761_vm6 = vcmask 191616   ;;  %vm828_vm7 = vcmask 257216  }
  0x4a   : > { %s1451_s21 = smov 64   ;;  %s1452_s29 = smov 40   ;;  %vm983_vm12 = vcmask 523264  }
  0x4b   : > { %553 = vmatpush.bf16.msra.mxu0 %v1205_v1  ;;  %s1453_s23 = smov 56   ;;  %s1454_s28 = smov 48  }
  0x4c   : > { %s1455_s20 = smov 8   ;;  %s1456_s14 = smov 16  }
  0x4d   : > { %s1457_s15 = smov 24  }
  0x4e   : > { %1157 = vmatmul.msk.bf16.vlgmr.msra.gmra.mxu0 %vm542_vm0, %v1672_v2 }
  0xcb   : > { %v555_v4 = vpop.f32.mrf.mxu0 }
  0xcc   : > { %v556_v5 = vadd.f32 %v1281_v3, %v555_v4 }
  0xce   : > { %v559_v6 = vpack.c.bf16 %v556_v5, %v556_v5 }
  0xd0   : > { %561 = vst.msk [vmem:[#allocation2] sm:$0xf] %vm560_vm1, %v559_v6 }
  0xd3   : > { %v557_v7 = vpop.f32.mrf.mxu0 }
  0xd7   : > { %v763_v8 = vld [vmem:[#allocation2] sm:$0xf] }
  0xd8   : > { %v629_v9 = vld [vmem:[#allocation2] sm:$0xf]  ;;  %v765_v11 = vunpack.c.l.b16 %v763_v8 }
  0xd9   : > { %v563_v10 = vld [vmem:[#allocation2] sm:$0xf]  ;;  %v631_v12 = vunpack.c.l.b16 %v629_v9 }
  0xda   : > { %v568_v13 = vunpack.c.l.b16 %v563_v10  ;;  %v1679_v14 = vpack.c.b16 %v765_v11, %v765_v11  ;;  %v696_v17 = vld [vmem:[#allocation2] sm:$0xf] }
  0xdb   : > { %v1681_v15 = vpack.c.b16 %v631_v12, %v631_v12  ;;  %v698_v18 = vunpack.c.l.b16 %v696_v17 }
  0xdc   : > { %v569_v16 = vpack.c.b16 %v568_v13, %v568_v13  ;;  %767 = vrot.lane.b32.xlu2 %v1679_v14, %s1444_s24 }
  0xdd   : > { %633 = vrot.lane.b32.xlu1 %v1681_v15, %s1445_s19  ;;  %v1685_v19 = vpack.c.b16 %v698_v18, %v698_v18 }
  0xde   : > { %570 = vrot.lane.b32.xlu0 %v569_v16, %s1446_s26 }
  0xe4   : > { %702 = vrot.lane.b32.xlu2 %v1685_v19, %s1447_s13  ;;  %s1846_s13 = sld [smem:[#allocation20_spill]] }
  0xe5   : > { %769 = vrot.lane.b32.xlu1 %v1679_v14, %s1448_s22 }
  0xe6   : > { %635 = vrot.lane.b32.xlu0 %v1681_v15, %s1449_s0 }
  0xee   : > { %700 = vrot.lane.b32.xlu0 %v1685_v19, %s1450_s25  ;;  %s1847_s25 = sld [smem:[#allocation21_spill]] }
 0x136   : > { %v768_v20 = vpop.permute.xlu2 %767 }
 0x13e   : > { %v703_v21 = vpop.permute.xlu2 %702 }
 0x13f   : > { %v708_v22 = vsel %vm572_vm2, %v703_v21, 0 }
 0x140   : > { %717 = vmatpush.bf16.xpose.msrb.mxu0 %v708_v22 }
 0x14f   : > { %v634_v23 = vpop.permute.xlu1 %633 }
 0x150   : > { %v571_v24 = vpop.permute.xlu0 %570 }
 0x151   : > { %v577_v25 = vsel %vm572_vm2, %v571_v24, 0 }
 0x152   : > { %586 = vmatpush.bf16.xpose.msra.mxu1 %v577_v25 }
 0x157   : > { %v770_v26 = vpop.permute.xlu1 %769 }
 0x158   : > { %v636_v27 = vpop.permute.xlu0 %635  ;;  %v775_v28 = vsel %vm572_vm2, %v770_v26, 0 }
 0x159   : > { %1158 = vmatmul.msk.bf16.vlgmr.msra.gmra.mxu1 %vm572_vm2, %v563_v10  ;;  %v641_v29 = vsel %vm572_vm2, %v636_v27, 0 }
 0x15a   : > { %650 = vmatpush.bf16.xpose.msra.mxu3 %v641_v29 }
 0x160   : > { %v701_v30 = vpop.permute.xlu0 %700 }
 0x161   : > { %1160 = vmatmul.msk.bf16.vlgmr.msra.gmra.mxu3 %vm572_vm2, %v634_v23  ;;  %1162 = vmatmul.msk.bf16.vlgmr.msrb.gmra.mxu0 %vm572_vm2, %v701_v30 }
 0x162   : > { %784 = vmatpush.bf16.xpose.msrb.mxu3 %v775_v28 }
 0x171   : > { %1164 = vmatmul.msk.bf16.vlgmr.msrb.gmra.mxu3 %vm572_vm2, %v768_v20 }
 0x1d6   : > { %v588_v32 = vpop.f32.mrf.mxu1 }
 0x1d7   : > { %v589_v33 = vadd.f32 %v1282_v31, %v588_v32 }
 0x1d9   : > { %v592_v34 = vsel %vm572_vm2, %v589_v33, -inf }
 0x1da   : > { %593 = vmax.xlane.f32.xlu1 %v592_v34 }
 0x1de   : > { %v590_v35 = vpop.f32.mrf.mxu1  ;;  %v719_v36 = vpop.f32.mrf.mxu0 }
 0x1df   : > { %v720_v41 = vadd.f32 %v1282_v31, %v719_v36 }
 0x1e1   : > { %v723_v43 = vsel %vm572_vm2, %v720_v41, -inf }
 0x1e4   : > { %v652_v37 = vpop.f32.mrf.mxu3 }
 0x1e5   : > { %v653_v38 = vadd.f32 %v1282_v31, %v652_v37 }
 0x1e6   : > { %v721_v39 = vpop.f32.mrf.mxu0 }
 0x1e7   : > { %v656_v40 = vsel %vm572_vm2, %v653_v38, -inf }
 0x1e8   : > { %657 = vmax.xlane.f32.xlu2 %v656_v40 }
 0x1ec   : > { %v654_v42 = vpop.f32.mrf.mxu3 }
 0x1ed   : > { %v1207_v42 = vld [vmem:[%s1811_s4] sm:$0xff] }
 0x1f0   : > { %724 = vmax.xlane.f32.xlu2 %v723_v43 }
 0x1f4   : > { %v786_v44 = vpop.f32.mrf.mxu3 }
 0x1f5   : > { %v787_v45 = vadd.f32 %v1282_v31, %v786_v44 }
 0x1f7   : > { %v790_v46 = vsel %vm572_vm2, %v787_v45, -inf }
 0x1f8   : > { %791 = vmax.xlane.f32.xlu0 %v790_v46 }
 0x1fc   : > { %v788_v47 = vpop.f32.mrf.mxu3 }
 0x1fd   : > { %v1283_v47 = vld [vmem:[%s1812_s5] ss:$0 sm:$0xff] }
 0x208   : > { %604 = vrot.lane.b32.xlu2 %v569_v16, %s1451_s21 }
 0x210   : > { %802 = vrot.lane.b32.xlu2 %v1679_v14, %s1452_s29 }
 0x24d   : > { %v594_v48 = vpop.xlane.xlu1 %593 }
 0x24e   : > { %v595_v49 = vsub.f32 %v589_v33, %v594_v48  ;;  %v867_v48 = vunpack.c.l.bf16 %v1672_v2 }
 0x250   : > { %v596_v50 = vmul.f32 1.442695, %v595_v49 }
 0x252   : > { %1290 = vpow2.f32 %v596_v50 }
 0x258   : > { %v1291_v51 = vpop.eup %1290 }
 0x259   : > { %v598_v52 = vsel %vm572_vm2, %v1291_v51, 0.0 }
 0x25a   : > { %599 = vadd.xlane.f32.xlu1 %v598_v52 }
 0x25b   : > { %v658_v53 = vpop.xlane.xlu2 %657 }
 0x25c   : > { %v659_v56 = vsub.f32 %v653_v38, %v658_v53 }
 0x25e   : > { %v660_v58 = vmul.f32 1.442695, %v659_v56 }
 0x263   : > { %v725_v54 = vpop.xlane.xlu2 %724 }
 0x264   : > { %v726_v55 = vsub.f32 %v720_v41, %v725_v54  ;;  %v1208_v41 = vld [vmem:[%s1811_s4 + $0x8] sm:$0xff]  ;;  %v1458_v54 = vmov 32.0  }
 0x265   : > { %860 = vmatpush.bf16.msra.mxu0 %v1208_v41 }
 0x266   : > { %v727_v57 = vmul.f32 1.442695, %v726_v55 }
 0x268   : > { %1292 = vpow2.f32 %v727_v57 }
 0x269   : > { %1294 = vpow2.f32 %v660_v58  ;;  %861 = vmatpush.bf16.msra.mxu0 %v1207_v42 }
 0x26b   : > { %v605_v59 = vpop.permute.xlu2 %604  ;;  %v792_v60 = vpop.xlane.xlu0 %791 }
 0x26c   : > { %v611_v61 = vsel %vm609_vm3, %v605_v59, 0  ;;  %v793_v63 = vsub.f32 %v787_v45, %v792_v60 }
 0x26d   : > { %620 = vmatpush.bf16.msra.mxu2 %v611_v61 }
 0x26e   : > { %v1293_v62 = vpop.eup %1292  ;;  %v794_v1 = vmul.f32 1.442695, %v793_v63 }
 0x26f   : > { %v729_v0 = vsel %vm572_vm2, %v1293_v62, 0.0  ;;  %v1295_v3 = vpop.eup %1294 }
 0x270   : > { %730 = vadd.xlane.f32.xlu0 %v729_v0  ;;  %1296 = vpow2.f32 %v794_v1  ;;  %v662_v4 = vsel %vm572_vm2, %v1295_v3, 0.0  ;;  %v1210_v1 = vld [vmem:[%s1815_s8 + $0x8] sm:$0xff] }
 0x273   : > { %668 = vrot.lane.b32.xlu1 %v1681_v15, %s1453_s23  ;;  %v803_v12 = vpop.permute.xlu2 %802 }
 0x274   : > { %v808_v15 = vsel %vm609_vm3, %v803_v12, 0 }
 0x276   : > { %v1297_v5 = vpop.eup %1296 }
 0x277   : > { %v796_v6 = vsel %vm572_vm2, %v1297_v5, 0.0 }
 0x278   : > { %663 = vadd.xlane.f32.xlu0 %v662_v4  ;;  %v1214_v4 = vld [vmem:[%s1817_s10 + $0x18] sm:$0xff] }
 0x279   : > { %991 = vmatpush.bf16.msra.mxu3 %v1214_v4 }
 0x280   : > { %797 = vadd.xlane.f32.xlu0 %v796_v6 }
 0x294   : > { %735 = vrot.lane.b32.xlu0 %v1685_v19, %s1454_s28 }
 0x2cd   : > { %v600_v7 = vpop.xlane.xlu1 %599 }
 0x2ce   : > { %1298 = vrcp.f32 %v600_v7  ;;  %v1213_v7 = vld [vmem:[%s1817_s10 + $0x10] sm:$0xff] }
 0x2cf   : > { %992 = vmatpush.bf16.msra.mxu3 %v1213_v7 }
 0x2d4   : > { %v1299_v8 = vpop.eup %1298 }
 0x2d5   : > { %v602_v9 = vmul.f32 %v1299_v8, %v1291_v51 }
 0x2d7   : > { %v603_v10 = vpack.c.bf16 %v602_v9, %v602_v9  ;;  %v1212_v9 = vld [vmem:[%s1817_s10 + $0x8] sm:$0xff] }
 0x2d8   : > { %993 = vmatpush.bf16.msra.mxu3 %v1212_v9 }
 0x2d9   : > { %1159 = vmatmul.msk.bf16.vlgmr.msra.gmra.mxu2 %vm572_vm2, %v603_v10 }
 0x2e3   : > { %v731_v11 = vpop.xlane.xlu0 %730 }
 0x2e5   : > { %v669_v13 = vpop.permute.xlu1 %668 }
 0x2e6   : > { %v674_v14 = vsel %vm609_vm3, %v669_v13, 0 }
 0x2e7   : > { %683 = vmatpush.bf16.msrb.mxu2 %v674_v14 }
 0x2eb   : > { %817 = vmatpush.bf16.msra.mxu2 %v808_v15  ;;  %v664_v16 = vpop.xlane.xlu0 %663 }
 0x2ec   : > { %1300 = vrcp.f32 %v664_v16  ;;  %v1284_v16 = vld [vmem:[%s1813_s6] ss:$0 sm:$0xff] }
 0x2f2   : > { %v1301_v17 = vpop.eup %1300 }
 0x2f3   : > { %v666_v18 = vmul.f32 %v1301_v17, %v1295_v3  ;;  %v798_v19 = vpop.xlane.xlu0 %797  ;;  %v1209_v3 = vld [vmem:[%s1815_s8] sm:$0xff] }
 0x2f4   : > { %1302 = vrcp.f32 %v798_v19 }
 0x2f5   : > { %v667_v20 = vpack.c.bf16 %v666_v18, %v666_v18  ;;  %1304 = vrcp.f32 %v731_v11  ;;  %v1285_v18 = vld [vmem:[%s1814_s7] ss:$0 sm:$0xff] }
 0x2f6   : > { %1306 = vrcp.f32 %v1458_v54 }
 0x2f7   : > { %1161 = vmatmul.msk.bf16.vlgmr.msrb.gmra.mxu2 %vm572_vm2, %v667_v20 }
 0x2fa   : > { %v1303_v21 = vpop.eup %1302 }
 0x2fb   : > { %v800_v22 = vmul.f32 %v1303_v21, %v1297_v5  ;;  %v1305_v23 = vpop.eup %1304 }
 0x2fc   : > { %v733_v24 = vmul.f32 %v1305_v23, %v1293_v62  ;;  %v1307_v55 = vpop.eup %1306  ;;  %v1211_v23 = vld [vmem:[%s1817_s10] sm:$0xff] }
 0x2fd   : > { %v801_v25 = vpack.c.bf16 %v800_v22, %v800_v22  ;;  %v875_v56 = vmul.f32 32.0, %v1307_v55  ;;  %vm879_vm8 = vweird.f32 %v1307_v55  ;;  %994 = vmatpush.bf16.msra.mxu3 %v1211_v23 }
 0x2fe   : > { %v734_v28 = vpack.c.bf16 %v733_v24, %v733_v24  ;;  %v1286_v24 = vld [vmem:[%s1816_s9] ss:$0 sm:$0xff] }
 0x2ff   : > { %v876_v57 = vsub.f32 1.0, %v875_v56 }
 0x301   : > { %v877_v58 = vmul.f32 %v1307_v55, %v876_v57 }
 0x303   : > { %v878_v59 = vadd.f32 %v1307_v55, %v877_v58 }
 0x305   : > { %v880_v60 = vsel %vm879_vm8, %v1307_v55, %v878_v59 }
 0x306   : > { %v736_v26 = vpop.permute.xlu0 %735 }
 0x307   : > { %1165 = vmatmul.msk.bf16.vlgmr.msra.gmra.mxu2 %vm572_vm2, %v801_v25  ;;  %v741_v27 = vsel %vm609_vm3, %v736_v26, 0 }
 0x308   : > { %750 = vmatpush.bf16.msrb.mxu1 %v741_v27 }
 0x30b   : > { %1163 = vmatmul.msk.bf16.vlgmr.msrb.gmra.mxu1 %vm572_vm2, %v734_v28 }
 0x30c   : > { %938 = vmatpush.bf16.msra.mxu1 %v1210_v1 }
 0x310   : > { %939 = vmatpush.bf16.msra.mxu1 %v1209_v3 }
 0x35c   : > { %v622_v29 = vpop.f32.mrf.mxu2 }
 0x35d   : > { %v626_v30 = vpack.c.bf16 %v622_v29, %v622_v29 }
 0x35f   : > { %628 = vst.msk [vmem:[#allocation3] sm:$0xf] %vm627_vm4, %v626_v30  ;;  %v1287_v30 = vld [vmem:[%s1818_s11] ss:$0 sm:$0xff] }
 0x364   : > { %v624_v31 = vpop.f32.mrf.mxu2 }
 0x37a   : > { %v685_v32 = vpop.f32.mrf.mxu2 }
 0x37b   : > { %v689_v33 = vpack.c.bf16 %v685_v32, %v685_v32 }
 0x37d   : > { %691 = vrot.lane.b32.xlu1 %v689_v33, %s1455_s20  ;;  %s1037_s20 = scalar_lea.sflag [#allocation6], %s1650_s27 }
 0x382   : > { %v687_v34 = vpop.f32.mrf.mxu2 }
 0x388   : > { %v752_v35 = vpop.f32.mrf.mxu1 }
 0x389   : > { %v756_v36 = vpack.c.bf16 %v752_v35, %v752_v35 }
 0x38a   : > { %v819_v37 = vpop.f32.mrf.mxu2 }
 0x38b   : > { %v823_v38 = vpack.c.bf16 %v819_v37, %v819_v37  ;;  %758 = vrot.lane.b32.xlu2 %v756_v36, %s1456_s14  ;;  %s1202_s14 = sshll.u32 %s1555_s17, 2  ;;  %s519_s17 = scalar_lea.vmem [#allocation9], %s1147_s18 }
 0x38c   : > { %s1047_s21 = scalar_lea.hbm %s1847_s25, %s1202_s14  ;;  %s1049_s23 = sshll.u32 %s519_s17, 4  ;;  %s1050_s23 = int_to_ptr.vmem [resolvable:$true] %s1049_s23 }
 0x38d   : > { %825 = vrot.lane.b32.xlu1 %v823_v38, %s1457_s15  ;;  %s1051_s28 = sshll.u32 %s1047_s21, 4  ;;  %s1392_s18 = scalar_lea.hbm %s1847_s25, 8  ;;  %s1052_s28 = int_to_ptr.hbm [resolvable:$true] %s1051_s28 }
 0x38e   : > { %s1386_s15 = sshra.s32 %s1052_s28, 4  ;;  %s1387_s15 = int_to_ptr.hbm [resolvable:$true] %s1386_s15 }
 0x38f   : > { %s1388_s24 = scalar_lea.hbm %s1387_s15, 4  ;;  %p1393_p10 = scmp.lt.s32.totalorder %s1387_s15, %s1847_s25 }
 0x390   : > { %v754_v39 = vpop.f32.mrf.mxu1  ;;  %p1389_p6 = scmp.ne.s32.totalorder %s1387_s15, %s1388_s24  ;;  %p1394_p2 = scmp.lt.s32.totalorder %s1392_s18, %s1388_s24 }
 0x392   : > { %v821_v40 = vpop.f32.mrf.mxu2  ;;  %p1390_p13 = pnand %p1389_p6, %p1584_p11  ;;  %p1395_p9 = por %p1394_p2, %p1393_p10 }
 0x394   : > { %p1391_p3 = pneg %p1390_p13 }
 0x396   : > { %p1396_p0 = pnand %p1395_p9, %p1391_p3 }
 0x3e5   : > { %v759_v44 = vpop.permute.xlu2 %758 }
 0x3ef   : > { %v692_v43 = vpop.permute.xlu1 %691 }
 0x3f0   : > { %695 = vst.msk [vmem:[#allocation3] sm:$0xf] %vm694_vm5, %v692_v43 }
 0x3f1   : > { %762 = vst.msk [vmem:[#allocation3] sm:$0xf] %vm761_vm6, %v759_v44 }
 0x3ff   : > { %v826_v45 = vpop.permute.xlu1 %825 }
 0x400   : > { %829 = vst.msk [vmem:[#allocation3] sm:$0xf] %vm828_vm7, %v826_v45 }
 0x407   : > { %v830_v46 = vld [vmem:[#allocation3] sm:$0xf] }
 0x408   : > { %1174 = vmatmul.msk.bf16.vlgmr.msra.gmra.mxu0 %vm542_vm0, %v830_v46 }
 0x485   : > { %v863_v49 = vpop.f32.mrf.mxu0 }
 0x486   : > { %v864_v50 = vadd.f32 %v1283_v47, %v863_v49 }
 0x488   : > { %v868_v51 = vadd.f32 %v867_v48, %v864_v50  ;;  %v1288_v50 = vld [vmem:[%s1819_s12] ss:$0 sm:$0xff] }
 0x48a   : > { %v871_v52 = vsel %vm542_vm0, %v868_v51, 0.0 }
 0x48b   : > { %872 = vadd.xlane.f32.xlu2 %v871_v52  ;;  %v1289_v52 = vld [vmem:[%s1846_s13] ss:$0 sm:$0xff] }
 0x48d   : > { %v865_v53 = vpop.f32.mrf.mxu0 }
 0x4fe   : > { %v873_v61 = vpop.xlane.xlu2 %872 }
 0x4ff   : > { %v881_v62 = vmul.f32 %v880_v60, %v873_v61 }
 0x501   : > { %v882_v63 = vsub.f32 %v868_v51, %v881_v62 }
 0x503   : > { %v883_v2 = vmul.f32 %v882_v63, %v882_v63 }
 0x505   : > { %v884_v0 = vsel %vm542_vm0, %v883_v2, 0.0 }
 0x506   : > { %885 = vadd.xlane.f32.xlu1 %v884_v0 }
 0x579   : > { %v886_v5 = vpop.xlane.xlu1 %885 }
 0x57a   : > { %v887_v6 = vmul.f32 %v886_v5, %v880_v60 }
 0x57c   : > { %v888_v8 = vadd.f32 1e-05, %v887_v6 }
 0x57e   : > { %1308 = vrsqrt.f32 %v888_v8  ;;  %vm895_vm10 = vweird.f32 %v888_v8 }
 0x584   : > { %v1309_v10 = vpop.eup %1308 }
 0x585   : > { %v890_v11 = vmul.f32 %v1309_v10, %v888_v8  ;;  %vm896_vm9 = vweird.f32 %v1309_v10 }
 0x586   : > { %vm897_vm11 = vmor %vm895_vm10, %vm896_vm9 }
 0x587   : > { %v891_v12 = vmul.f32 %v1309_v10, %v890_v11 }
 0x589   : > { %v892_v13 = vmul.f32 0.5, %v891_v12 }
 0x58b   : > { %v893_v14 = vsub.f32 1.5, %v892_v13 }
 0x58d   : > { %v894_v15 = vmul.f32 %v1309_v10, %v893_v14 }
 0x58f   : > { %v898_v17 = vsel %vm897_vm11, %v1309_v10, %v894_v15 }
 0x590   : > { %v899_v19 = vmul.f32 %v898_v17, %v882_v63 }
 0x592   : > { %v903_v20 = vmul.f32 %v1284_v16, %v899_v19 }
 0x594   : > { %v907_v21 = vadd.f32 %v1285_v18, %v903_v20 }
 0x596   : > { %v908_v22 = vpack.c.bf16 %v907_v21, %v907_v21 }
 0x598   : > { %1183 = vmatmul.msk.bf16.vlgmr.msra.gmra.mxu1 %vm542_vm0, %v908_v22 }
 0x615   : > { %v941_v25 = vpop.f32.mrf.mxu1 }
 0x616   : > { %v942_v26 = vadd.f32 %v1286_v24, %v941_v25 }
 0x618   : > { %v945_v27 = vmax.f32 %v942_v26, 0.0 }
 0x61a   : > { %v946_v28 = vpack.c.bf16 %v945_v27, %v945_v27 }
 0x61c   : > { %1200 = vmatmul.msk.bf16.vlgmr.msra.gmra.mxu3 %vm983_vm12, %v946_v28 }
 0x61d   : > { %v943_v29 = vpop.f32.mrf.mxu1 }
 0x69f   : > { %v996_v31 = vpop.f32.mrf.mxu3 }
 0x6a0   : > { %v997_v32 = vadd.f32 %v1287_v30, %v996_v31 }
 0x6a2   : > { %v1000_v33 = vadd.f32 %v997_v32, %v907_v21 }
 0x6a4   : > { %v1003_v34 = vsel %vm542_vm0, %v1000_v33, 0.0 }
 0x6a5   : > { %1004 = vadd.xlane.f32.xlu0 %v1003_v34 }
 0x6a7   : > { %v998_v35 = vpop.f32.mrf.mxu3 }
 0x718   : > { %v1005_v36 = vpop.xlane.xlu0 %1004 }
 0x719   : > { %v1006_v37 = vmul.f32 %v1005_v36, %v880_v60 }
 0x71b   : > { %v1007_v38 = vsub.f32 %v1000_v33, %v1006_v37 }
 0x71d   : > { %v1008_v39 = vmul.f32 %v1007_v38, %v1007_v38 }
 0x71f   : > { %v1009_v40 = vsel %vm542_vm0, %v1008_v39, 0.0  ;;  %vm1034_vm0 = vcmask 257024  }
 0x720   : > { %1010 = vadd.xlane.f32.xlu2 %v1009_v40 }
 0x793   : > { %v1011_v41 = vpop.xlane.xlu2 %1010 }
 0x794   : > { %v1012_v42 = vmul.f32 %v1011_v41, %v880_v60 }
 0x796   : > { %v1013_v43 = vadd.f32 1e-05, %v1012_v42 }
 0x798   : > { %1310 = vrsqrt.f32 %v1013_v43  ;;  %vm1020_vm14 = vweird.f32 %v1013_v43 }
 0x79e   : > { %v1311_v44 = vpop.eup %1310 }
 0x79f   : > { %v1015_v45 = vmul.f32 %v1311_v44, %v1013_v43  ;;  %vm1021_vm13 = vweird.f32 %v1311_v44 }
 0x7a0   : > { %vm1022_vm15 = vmor %vm1020_vm14, %vm1021_vm13 }
 0x7a1   : > { %v1016_v46 = vmul.f32 %v1311_v44, %v1015_v45 }
 0x7a3   : > { %v1017_v47 = vmul.f32 0.5, %v1016_v46 }
 0x7a5   : > { %v1018_v48 = vsub.f32 1.5, %v1017_v47 }
 0x7a7   : > { %v1019_v49 = vmul.f32 %v1311_v44, %v1018_v48 }
 0x7a9   : > { %v1023_v51 = vsel %vm1022_vm15, %v1311_v44, %v1019_v49 }
 0x7aa   : > { %v1024_v53 = vmul.f32 %v1023_v51, %v1007_v38 }
 0x7ac   : > { %v1028_v54 = vmul.f32 %v1288_v50, %v1024_v53 }
 0x7ae   : > { %v1032_v55 = vadd.f32 %v1289_v52, %v1028_v54 }
 0x7b0   : > { %v1033_v56 = vpack.c.bf16 %v1032_v55, %v1032_v55 }
 0x7b2   : > { %1035 = vst.msk [vmem:[%s519_s17] sm:$0xf] %vm1034_vm0, %v1033_v56 }
 0x7b3   : > { %1399 = shalt.err (!%p1396_p0)
}
 0x7b4   : > { %1219 = dma.vmem_to_hbm [thread:$0]  (%p1584_p11), %s1050_s23, 64, %s1052_s28, %s1037_s20  }
 0x7b5 PF: > { %s1849_s27 = sld [smem:[#allocation13_spill]]  ;;  %p1851_p1 = scmp.ge.s32.totalorder %s1442_s16, 2 }
 0x7b7   : > { %p1229_p4 = pnand %p1851_p1, %p1588_p12 }
 0x7b9   : > { %p1230_p7 = pneg %p1229_p4 }
 0x7bb   : > { %s1063_s0 = sand.u32 1, %s1849_s27  }
 0x7bc   : > { %s1064_s21 = scalar_lea.sflag [#allocation6], %s1063_s0 }
 0x7bd   : > { %1425 = dma.done.wait (%p1230_p7), %s1064_s21, 64  }
 0x7be   : > { %1427 = vsyncadd (%p1230_p7), %s1064_s21, 4294967232  ;;  %s1852_s16 = sld [smem:[#allocation15_spill]]  ;;  %s1855_s29 = smov %s1434_s30 }
 0x7bf   : > { %s1853_s17 = sld [smem:[#allocation14_spill]] }
 0x7c0   : > { %s1854_s15 = sld [smem:[#allocation16_spill]] }
 0x7c4   : > { %p30_p5 = scmp.ge.s32.totalorder %s1852_s16, 4  }
 0x7c5   : > { %s1856_s30 = smov %s1853_s17 }
 0x7c6   :  { %32 = sbr.rel (!%p30_p5) target bundleno = 11 (0xb), region = 134 }
 0x7cb   :  { %1070 = vsyncpa [#allocation5], 1 }
 0x7cc   :  { %1072 = vsyncpa [#allocation5 + $0x1], 1 }
 0x7cd   :  { %1073 = vsyncpa [#allocation8], 1 }
 0x7ce   :  { %1075 = vsyncpa [#allocation8 + $0x1], 1 }
 0x7cf   :  { %1076 = vsyncpa [#allocation6], 1 }
 0x7d0   :  { %1078 = vsyncpa [#allocation6 + $0x1], 1 }

</bundles_post_ra>
